<compile_context>
chip_gen: v7x
topology: tpu7x:2x2x1
jax: 0.10.0
libtpu: 0.0.40
codegen_flags: <defaults>
</compile_context>

<pallas_src>
import functools
import math

import jax
import jax.numpy as jnp
from jax.experimental import pallas as pl
from jax.experimental.pallas import tpu as pltpu


# ---------------------------------------------------------------------------
# Kernel: a single VPU multiply per tile.
#   (TR, W) * (1, W)   -- lane-periodic scale (broadcast over sublanes)
#   (TR, W) * (TR, 1)  -- per-row scale      (broadcast over lanes)
# Mixed input dtypes promote in-register; the store casts to the out dtype.
# ---------------------------------------------------------------------------
def _scale_kernel(x_ref, s_ref, o_ref):
    o_ref[...] = (x_ref[...] * s_ref[...]).astype(o_ref.dtype)


_DEFAULT_MIN_PALLAS_BYTES = 512 * 1024   # below this, XLA's fused multiply wins
_MAX_SCALE_ROW_BYTES = 256 * 1024        # cap on the resident lane-dense scale row


@functools.lru_cache(maxsize=1)
def _gen_tuning():
    """(target in+out bytes per grid step, vmem_limit_bytes, use CORE_PARALLEL)."""
    try:
        kind = jax.devices()[0].device_kind.lower()
    except Exception:
        kind = ""
    if "v7" in kind:       # 64 MiB physical VMEM, ~3.2 TB/s, 2 TCs/chip
        return 12 * 2**20, 48 * 2**20, True
    if "v6" in kind:       # 128 MiB physical VMEM, ~1.4 TB/s
        return 8 * 2**20, 64 * 2**20, False
    # v5e / unknown: stay well under the 16 MiB scoped-VMEM default.
    return 4 * 2**20, None, False


def _sublane_multiple(dtype):
    # Sub-32-bit dtypes pack 2/4 rows per sublane: keep row tiles a multiple
    # of the packing factor (8 for 32-bit, 16 for bf16/fp16, 32 for int8/fp8).
    return 8 * max(1, 4 // jnp.dtype(dtype).itemsize)


def _row_tile(n_rows, n_lanes, in_dtype, out_dtype, target_io_bytes):
    """Largest row tile (packing-multiple, <= n_rows) moving ~target_io_bytes
    of input + output per grid step."""
    mult = _sublane_multiple(in_dtype)
    if n_rows < mult:
        return n_rows                       # full-dim block is always legal
    per_row = n_lanes * (jnp.dtype(in_dtype).itemsize +
                         jnp.dtype(out_dtype).itemsize)
    tr = (target_io_bytes // max(1, per_row)) // mult * mult
    tr = max(mult, tr)
    return min(tr, (n_rows // mult) * mult)


def _pallas_scale_2d(x2, scale, *, scale_per_row, out_dtype, donate):
    """out[r, l] = x2[r, l] * (scale[r] if scale_per_row else scale[l])."""
    R, W = x2.shape
    target_io, vmem_limit, core_parallel = _gen_tuning()
    tr = _row_tile(R, W, x2.dtype, out_dtype, target_io)

    if scale_per_row:
        s = scale.reshape(R, 1).astype(out_dtype)
        s_spec = pl.BlockSpec((tr, 1), lambda i: (i, 0))
    else:
        s = scale.reshape(1, W).astype(out_dtype)
        # Constant block index: the scale row is fetched once and stays
        # resident in VMEM (no per-step re-DMA).
        s_spec = pl.BlockSpec((1, W), lambda i: (0, 0))

    grid = (pl.cdiv(R, tr),)   # ragged last block handled by Pallas, no padding
    in_isz = jnp.dtype(x2.dtype).itemsize
    out_isz = jnp.dtype(out_dtype).itemsize
    cost = pl.CostEstimate(
        flops=R * W,
        transcendentals=0,
        bytes_accessed=R * W * (in_isz + out_isz) + int(s.size) * out_isz)

    if core_parallel and hasattr(pltpu, "CORE_PARALLEL"):
        dim_sem = (pltpu.CORE_PARALLEL,)   # shard the row grid over 2 TCs (v7x)
    else:
        dim_sem = ("parallel",)
    cp_kwargs = dict(dimension_semantics=dim_sem)
    if vmem_limit is not None:
        cp_kwargs["vmem_limit_bytes"] = int(vmem_limit)

    # Alias (donate) x only when the caller opted in AND dtypes match;
    # otherwise XLA would insert a defensive full copy of x.
    aliases = ({0: 0} if (donate and jnp.dtype(out_dtype) == jnp.dtype(x2.dtype))
               else {})

    return pl.pallas_call(
        _scale_kernel,
        out_shape=jax.ShapeDtypeStruct((R, W), out_dtype),
        grid_spec=pltpu.PrefetchScalarGridSpec(
            num_scalar_prefetch=0,
            grid=grid,
            in_specs=[pl.BlockSpec((tr, W), lambda i: (i, 0)), s_spec],
            out_specs=pl.BlockSpec((tr, W), lambda i: (i, 0)),
        ),
        compiler_params=pltpu.CompilerParams(**cp_kwargs),
        input_output_aliases=aliases,
        cost_estimate=cost,
    )(x2, s)


def layer_scale(x, weight, data_format="channels_last", *, donate_x=False,
                min_pallas_bytes=_DEFAULT_MIN_PALLAS_BYTES):
    """JAX/Pallas equivalent of LayerScale.forward.

    donate_x=True mirrors the optional `inplace` behaviour by aliasing x with
    the output (only effective if the caller actually donates x under jit).
    """
    assert data_format in ("channels_last", "channels_first"), (
        "'data_format' could only be channels_last or channels_first.")
    x = jnp.asarray(x)
    weight = jnp.asarray(weight)
    out_dtype = jnp.result_type(x.dtype, weight.dtype)   # PyTorch promotion
    total = int(x.size)
    small = total * jnp.dtype(x.dtype).itemsize < min_pallas_bytes
    mult = _sublane_multiple(x.dtype)
    out_isz = jnp.dtype(out_dtype).itemsize

    if data_format == "channels_first":
        # PyTorch does x * weight.view(-1, 1, 1): the scaled axis is ndim-3
        # (axis 1 for the documented (B, C, H, W) layout).
        w_cf = weight.reshape((-1, 1, 1))
        ax = x.ndim - 3
        if small or x.ndim < 3 or int(weight.size) != int(x.shape[ax]):
            return x * w_cf
        lead = int(math.prod(x.shape[:ax]))
        C = int(x.shape[ax])
        S = int(math.prod(x.shape[ax + 1:]))
        if lead < 1 or S < 1:
            return x * w_cf

        # Preferred: lane-dense flat view.  The flat scale is periodic with
        # period P = C*S; pack rows of W = lcm(P, 128) lanes so every store is
        # a full-lane vst (big win when the spatial extent is small).
        P = C * S
        q = 128 // math.gcd(P, 128)
        W = P * q
        if (W * out_isz <= _MAX_SCALE_ROW_BYTES and total % W == 0
                and total // W >= mult):
            scale_row = jnp.tile(jnp.repeat(weight, S), q)
            out2 = _pallas_scale_2d(x.reshape(total // W, W), scale_row,
                                    scale_per_row=False, out_dtype=out_dtype,
                                    donate=donate_x)
            return out2.reshape(x.shape)

        # Fallback: (lead*C, S) view with a per-row channel scale (no HBM
        # transposes).  Stores are masked only on the ragged last 128-lane
        # chunk of each row, which is negligible for wide spatial extents.
        rows = lead * C
        x2 = x.reshape(rows, S)
        row_scale = jnp.tile(weight, lead)   # row r = b*C + c -> weight[c]
        out2 = _pallas_scale_2d(x2, row_scale, scale_per_row=True,
                                out_dtype=out_dtype, donate=donate_x)
        return out2.reshape(x.shape)

    # ---- channels_last: scale over the trailing axis C ----------------------
    C = int(x.shape[-1])
    if small or int(weight.size) != C:
        return x * weight

    q = 128 // math.gcd(C, 128)
    W = C * q                         # lcm(C, 128): lane-dense width, C | W
    bulk = (total // W) * W
    if W * out_isz <= _MAX_SCALE_ROW_BYTES and bulk // W >= mult:
        scale_row = jnp.tile(weight, q)   # lane l -> weight[l % C]
        if bulk == total:
            out2 = _pallas_scale_2d(x.reshape(total // W, W), scale_row,
                                    scale_per_row=False, out_dtype=out_dtype,
                                    donate=donate_x)
            return out2.reshape(x.shape)
        # Ragged total: lane-dense bulk through Pallas, < W-element tail
        # (always a whole number of channel rows) through XLA.
        xf = x.reshape(-1)
        out_bulk = _pallas_scale_2d(xf[:bulk].reshape(bulk // W, W), scale_row,
                                    scale_per_row=False, out_dtype=out_dtype,
                                    donate=False)
        tail = (xf[bulk:].reshape(-1, C) * weight).reshape(-1).astype(out_dtype)
        return jnp.concatenate([out_bulk.reshape(-1), tail]).reshape(x.shape)

    # Last resort: lane-masked (rows, C) view (block lane dim == full dim).
    rows = total // C
    if rows >= 1:
        out2 = _pallas_scale_2d(x.reshape(rows, C), weight,
                                scale_per_row=False, out_dtype=out_dtype,
                                donate=donate_x)
        return out2.reshape(x.shape)
    return x * weight


if __name__ == "__main__":
    key = jax.random.PRNGKey(0)
    k = jax.random.split(key, 8)

    dim = 32
    layer_scale_init_value = 1e-5
    # nn.Parameter(torch.ones(dim) * layer_scale_init_value)
    weight = jnp.ones((dim,), dtype=jnp.float32) * layer_scale_init_value
    force = dict(min_pallas_bytes=0)   # force the Pallas path at demo sizes

    # 1) channels_last (B, N, C): lane-dense packed path (C=32 -> 128 lanes).
    x = jax.random.normal(k[0], (2, 256, dim), dtype=jnp.float32)
    out = jax.block_until_ready(layer_scale(x, weight, "channels_last", **force))
    assert out.shape == x.shape and jnp.allclose(out, x * weight, atol=1e-6)

    # 2) channels_last with a ragged packed-row count (75 rows -> partial block).
    x = jax.random.normal(k[1], (3, 100, dim), dtype=jnp.float32)
    out = jax.block_until_ready(layer_scale(x, weight, "channels_last", **force))
    assert jnp.allclose(out, x * weight, atol=1e-6)

    # 3) channels_last where total % lcm(C,128) != 0: Pallas bulk + XLA tail.
    x = jax.random.normal(k[2], (1, 75, dim), dtype=jnp.float32)
    out = jax.block_until_ready(layer_scale(x, weight, "channels_last", **force))
    assert jnp.allclose(out, x * weight, atol=1e-6)

    # 4) channels_first (B, C, H, W): per-row scale over (B*C, H*W).
    x = jax.random.normal(k[3], (2, dim, 16, 16), dtype=jnp.float32)
    out = jax.block_until_ready(layer_scale(x, weight, "channels_first", **force))
    assert jnp.allclose(out, x * weight.reshape(-1, 1, 1), atol=1e-6)

    # 5) channels_first hitting the lane-dense flat path (period C*H*W).
    dim4 = 4
    w4 = jnp.ones((dim4,), dtype=jnp.float32) * layer_scale_init_value
    x = jax.random.normal(k[4], (8, dim4, 16, 16), dtype=jnp.float32)
    out = jax.block_until_ready(layer_scale(x, w4, "channels_first", **force))
    assert jnp.allclose(out, x * w4.reshape(-1, 1, 1), atol=1e-6)

    # 6) channels_first with spatial not a multiple of 128 (masked fallback).
    x = jax.random.normal(k[5], (2, dim4, 7, 7), dtype=jnp.float32)
    out = jax.block_until_ready(layer_scale(x, w4, "channels_first", **force))
    assert jnp.allclose(out, x * w4.reshape(-1, 1, 1), atol=1e-6)

    # 7) dtype promotion: bf16 x with f32 weight -> f32 output (PyTorch rule).
    x = jax.random.normal(k[6], (2, 64, dim), dtype=jnp.bfloat16)
    out = jax.block_until_ready(layer_scale(x, weight, "channels_last", **force))
    assert out.dtype == jnp.float32 and jnp.allclose(out, x * weight, atol=1e-6)

    # 8) small input at the default threshold: wrapper stays on XLA fusion.
    x = jax.random.normal(k[7], (2, 8, dim), dtype=jnp.float32)
    out = jax.block_until_ready(layer_scale(x, weight, "channels_last"))
    assert jnp.allclose(out, x * weight, atol=1e-6)

    print("KERNEL_OK")
</pallas_src>

<mosaic_0001>
module attributes {stable_mosaic.version = 11 : i64} {
  func.func @_scale_kernel(%arg0: i32, %arg1: memref<128x128xf32, #tpu.memory_space<vmem>>, %arg2: memref<1x128xf32, #tpu.memory_space<vmem>>, %arg3: memref<128x128xf32, #tpu.memory_space<vmem>>) attributes {dimension_semantics = [#tpu.dimension_semantics<parallel>], iteration_bounds = array<i64: 1>, scalar_prefetch = 0 : i64, scratch_operands = 0 : i64, tpu.core_type = #tpu.core_type<tc>, window_params = [{transform_indices = @transform_0, window_bounds = array<i64: 128, 128>}, {pipeline_mode = #tpu.pipeline_mode<synchronous>, transform_indices = @transform_1, window_bounds = array<i64: 1, 128>}, {transform_indices = @transform_2, window_bounds = array<i64: 128, 128>}]} {
    %c0 = arith.constant 0 : index
    %c0_0 = arith.constant 0 : index
    %0 = vector.load %arg1[%c0, %c0_0] : memref<128x128xf32, #tpu.memory_space<vmem>>, vector<128x128xf32>
    %c0_1 = arith.constant 0 : index
    %c0_2 = arith.constant 0 : index
    %1 = vector.load %arg2[%c0_1, %c0_2] : memref<1x128xf32, #tpu.memory_space<vmem>>, vector<1x128xf32>
    %2 = vector.broadcast %1 : vector<1x128xf32> to vector<128x128xf32>
    %3 = arith.mulf %0, %2 : vector<128x128xf32>
    %c0_3 = arith.constant 0 : index
    %c0_4 = arith.constant 0 : index
    %4 = vector.load %arg3[%c0_3, %c0_4] : memref<128x128xf32, #tpu.memory_space<vmem>>, vector<128x128xf32>
    tpu.vector_store %arg3[%c0_3, %c0_4], %3 {strides = array<i32>} : memref<128x128xf32, #tpu.memory_space<vmem>>, vector<128x128xf32>,
    return
  }
  func.func @transform_0(%arg0: i32) -> (i32, i32) {
    %c0_i32 = arith.constant 0 : i32
    %c0_i32_0 = arith.constant 0 : i32
    return %arg0, %c0_i32 : i32, i32
  }
  func.func @transform_1(%arg0: i32) -> (i32, i32) {
    %c0_i32 = arith.constant 0 : i32
    %c0_i32_0 = arith.constant 0 : i32
    %c0_i32_1 = arith.constant 0 : i32
    return %c0_i32, %c0_i32_0 : i32, i32
  }
  func.func @transform_2(%arg0: i32) -> (i32, i32) {
    %c0_i32 = arith.constant 0 : i32
    %c0_i32_0 = arith.constant 0 : i32
    return %arg0, %c0_i32 : i32, i32
  }
}

</mosaic_0001>

<bundles_post_ra>
// kernel: tpu_custom_call.1
= control target key start
LH: loop header
LB: loop body
LE: loop exit
PB: predicated region body
PF: predicated region fallthrough
CT: control target
= control target key end

     0   :  { %7 = vsyncpa [#allocation3], 0  ;;  %s203_s0 = inlined_call_operand.hbm [shape: f32[128,128], index: 0, kind: input, shape index: {}]   ;;  %s204_s1 = inlined_call_operand.vmem [shape: f32[1,128], index: 1, kind: input, shape index: {}]   ;;  %s205_s2 = inlined_call_operand.hbm [shape: f32[128,128], index: 2, kind: output, shape index: {}]  }
   0x1   :  { %8 = vsyncpa [#allocation4], 0  ;;  %s151_s9 = smov [#allocation2]   ;;  %s103_s13 = scalar_lea.hbm %s203_s0, 2048 }
   0x2   :  { %s14_s10 = sshll.u32 %s151_s9, 4  ;;  %p104_p0 = scmp.ne.s32.totalorder %s203_s0, %s103_s13  ;;  %s15_s10 = int_to_ptr.vmem [resolvable:$true] %s14_s10 }
   0x3   :  { %p107_p1 = scmp.lt.u32.totalorder %s103_s13, %s203_s0 }
   0x5   :  { %p109_p2 = pnand %p107_p1, %p104_p0 }
   0x7   :  { %112 = shalt.err (!%p109_p2)
}
   0x8   :  { %s113_s18 = scalar_lea.vmem %s15_s10, 2048  ;;  %p118_p4 = scmp.lt.s32.totalorder %s15_s10, %s15_s10 }
   0x9   :  { %p114_p3 = scmp.ne.s32.totalorder %s15_s10, %s113_s18  ;;  %p119_p5 = scmp.lt.s32.totalorder %s113_s18, %s113_s18 }
   0xb   :  { %p120_p6 = por %p119_p5, %p118_p4 }
   0xd   :  { %p121_p7 = pnand %p120_p6, %p114_p3 }
   0xf   :  { %124 = shalt.err (!%p121_p7)
}
  0x10   :  { %s152_s19 = smov 128   ;;  %s153_s20 = smov 8  }
  0x11   :  { %20 = dma.hbm_to_vmem [thread:$0]  %s203_s0, 2048, %s15_s10, [#allocation3], %s152_s19, %s152_s19, %s153_s20  }
  0x12   :  { %147 = dma.done.wait [#allocation3], 2048  }
  0x13   :  { %148 = vsyncadd [#allocation3], 4294965248  ;;  %v26_v0 = vld [vmem:[#allocation2] sm:$0xff]  ;;  %v27_v2 = vld [vmem:[#allocation2 + $0x8] sm:$0xff]  ;;  %s154_s0 = smov [#allocation5]  }
  0x14   :  { %v98_v1 = vld [vmem:[%s204_s1] ss:$0 sm:$0xff]  ;;  %v28_v5 = vld [vmem:[#allocation2 + $0x10] sm:$0xff]  ;;  %v29_v6 = vld [vmem:[#allocation2 + $0x18] sm:$0xff]  ;;  %s86_s1 = sshll.u32 %s154_s0, 4  ;;  %s87_s1 = int_to_ptr.vmem [resolvable:$true] %s86_s1 }
  0x15   :  { %v49_v3 = vmul.f32 %v98_v1, %v26_v0  ;;  %v50_v4 = vmul.f32 %v98_v1, %v27_v2  ;;  %v30_v7 = vld [vmem:[#allocation2 + $0x20] sm:$0xff]  ;;  %v51_v8 = vmul.f32 %v98_v1, %v28_v5  ;;  %v52_v9 = vmul.f32 %v98_v1, %v29_v6  ;;  %v31_v11 = vld [vmem:[#allocation2 + $0x28] sm:$0xff]  ;;  %v32_v12 = vld [vmem:[#allocation2 + $0x30] sm:$0xff]  ;;  %s125_s25 = scalar_lea.vmem %s87_s1, 2048  ;;  %p130_p9 = scmp.lt.s32.totalorder %s87_s1, %s87_s1 }
  0x16   :  { %v53_v10 = vmul.f32 %v98_v1, %v30_v7  ;;  %v33_v13 = vld [vmem:[#allocation2 + $0x38] sm:$0xff]  ;;  %v54_v14 = vmul.f32 %v98_v1, %v31_v11  ;;  %v55_v15 = vmul.f32 %v98_v1, %v32_v12  ;;  %v34_v17 = vld [vmem:[#allocation2 + $0x40] sm:$0xff]  ;;  %v35_v18 = vld [vmem:[#allocation2 + $0x48] sm:$0xff]  ;;  %p126_p8 = scmp.ne.s32.totalorder %s87_s1, %s125_s25  ;;  %p131_p10 = scmp.lt.s32.totalorder %s125_s25, %s125_s25 }
  0x17   :  { %65 = vst [vmem:[#allocation5] sm:$0xff] %v49_v3  ;;  %66 = vst [vmem:[#allocation5 + $0x8] sm:$0xff] %v50_v4  ;;  %v56_v16 = vmul.f32 %v98_v1, %v33_v13  ;;  %v36_v19 = vld [vmem:[#allocation2 + $0x50] sm:$0xff]  ;;  %v57_v20 = vmul.f32 %v98_v1, %v34_v17  ;;  %v58_v21 = vmul.f32 %v98_v1, %v35_v18  ;;  %v37_v23 = vld [vmem:[#allocation2 + $0x58] sm:$0xff] }
  0x18   :  { %67 = vst [vmem:[#allocation5 + $0x10] sm:$0xff] %v51_v8  ;;  %68 = vst [vmem:[#allocation5 + $0x18] sm:$0xff] %v52_v9  ;;  %v59_v22 = vmul.f32 %v98_v1, %v36_v19  ;;  %v38_v24 = vld [vmem:[#allocation2 + $0x60] sm:$0xff]  ;;  %v39_v25 = vld [vmem:[#allocation2 + $0x68] sm:$0xff]  ;;  %v60_v26 = vmul.f32 %v98_v1, %v37_v23  ;;  %p132_p11 = por %p131_p10, %p130_p9 }
  0x19   :  { %69 = vst [vmem:[#allocation5 + $0x20] sm:$0xff] %v53_v10  ;;  %70 = vst [vmem:[#allocation5 + $0x28] sm:$0xff] %v54_v14  ;;  %v61_v27 = vmul.f32 %v98_v1, %v38_v24  ;;  %v62_v28 = vmul.f32 %v98_v1, %v39_v25  ;;  %v40_v29 = vld [vmem:[#allocation2 + $0x70] sm:$0xff]  ;;  %v41_v30 = vld [vmem:[#allocation2 + $0x78] sm:$0xff] }
  0x1a   :  { %71 = vst [vmem:[#allocation5 + $0x30] sm:$0xff] %v55_v15  ;;  %72 = vst [vmem:[#allocation5 + $0x38] sm:$0xff] %v56_v16  ;;  %v63_v31 = vmul.f32 %v98_v1, %v40_v29  ;;  %v64_v32 = vmul.f32 %v98_v1, %v41_v30  ;;  %p133_p12 = pnand %p132_p11, %p126_p8 }
  0x1b   :  { %73 = vst [vmem:[#allocation5 + $0x40] sm:$0xff] %v57_v20  ;;  %74 = vst [vmem:[#allocation5 + $0x48] sm:$0xff] %v58_v21 }
  0x1c   :  { %75 = vst [vmem:[#allocation5 + $0x50] sm:$0xff] %v59_v22  ;;  %76 = vst [vmem:[#allocation5 + $0x58] sm:$0xff] %v60_v26 }
  0x1d   :  { %77 = vst [vmem:[#allocation5 + $0x60] sm:$0xff] %v61_v27  ;;  %78 = vst [vmem:[#allocation5 + $0x68] sm:$0xff] %v62_v28 }
  0x1e   :  { %79 = vst [vmem:[#allocation5 + $0x70] sm:$0xff] %v63_v31  ;;  %80 = vst [vmem:[#allocation5 + $0x78] sm:$0xff] %v64_v32 }
  0x1f   :  { %136 = shalt.err (!%p133_p12)
}
  0x20   :  { %s137_s28 = scalar_lea.hbm %s205_s2, 2048 }
  0x21   :  { %p138_p13 = scmp.ne.s32.totalorder %s205_s2, %s137_s28  ;;  %p141_p0 = scmp.lt.u32.totalorder %s137_s28, %s205_s2 }
  0x23   :  { %p143_p1 = pnand %p141_p0, %p138_p13 }
  0x25   :  { %146 = shalt.err (!%p143_p1)
}
  0x26   :  { %92 = dma.vmem_to_hbm [thread:$0]  %s87_s1, 2048, %s205_s2, [#allocation4], %s152_s19, %s152_s19, %s153_s20  }
  0x27   :  { %149 = dma.done.wait [#allocation4], 2048  }
  0x28   :  { %150 = vsyncadd [#allocation4], 4294965248 }
  0x29   :  { %96 = vsyncpa [#allocation3], 1 }
  0x2a   :  { %97 = vsyncpa [#allocation4], 1 }

</bundles_post_ra>
